<compile_context>
chip_gen: v6e
topology: v6e:2x2x1
jax: 0.10.0
libtpu: 0.0.40
codegen_flags: <defaults>
</compile_context>

<pallas_src>
import math
from functools import partial

import jax
import jax.numpy as jnp
from jax.experimental import pallas as pl
from jax.experimental.pallas import tpu as pltpu

_SUBLANE = 8
_LANE = 128
_VMEM_LIMIT = 32 << 20          # safe ceiling on v5e/v6e/v7x; above v5e's 16 MiB default
_VMEM_HEADROOM = 4 << 20        # slack for compiler-internal scratch


def _round_up(n, m):
    return (n + m - 1) // m * m


def _choose_tm(B, K, Np):
    """Batch-tile size: multiple of 8, VMEM-budgeted, megacore-friendly, low pad waste."""
    Bp8 = _round_up(B, _SUBLANE)
    # Bytes resident regardless of tm (assume double-buffered to be conservative).
    fixed = 2 * 4 * (K * Np + Np)                      # weight + bias, f32
    avail = _VMEM_LIMIT - _VMEM_HEADROOM - fixed
    # Per batch row, double-buffered: one output row (Np f32) + one x row (K f32).
    cap = max(_SUBLANE, (avail // (2 * 4 * (Np + K))) // _SUBLANE * _SUBLANE)
    cap = min(cap, 512, Bp8)
    # Keep >= 2 grid blocks when the batch allows it (v7x: give both TensorCores work).
    if Bp8 >= 2 * _SUBLANE:
        cap = min(cap, max(_SUBLANE, (Bp8 // 2) // _SUBLANE * _SUBLANE))
    # Largest multiple of 8 <= cap whose batch padding wastes <= ~12.5% extra rows.
    waste_budget = Bp8 // 8
    for cand in range(cap, _SUBLANE - 1, -_SUBLANE):
        if _round_up(Bp8, cand) - Bp8 <= waste_budget:
            return cand
    return _SUBLANE


def _expand_kernel(x_ref, wt_ref, b_ref, o_ref):
    # One MXU matmul over the resident weight + VPU bias add; full-N lane-dense store.
    o_ref[...] = (
        jnp.dot(x_ref[...], wt_ref[...], preferred_element_type=jnp.float32)
        + b_ref[...]
    )


@partial(jax.jit, static_argnames=("img_depth", "h_w"))
def expanding_layer(x, wt, b2, img_depth, h_w):
    """JAX/Pallas equivalent of ExpandingLayer.forward.

    x:  (B, n_classes) float32
    wt: (n_classes, Np) float32  -- weight PRE-TRANSPOSED, out_dim zero-padded to mult of 128
    b2: (1, Np) float32          -- bias, padded to match wt
    returns (B, img_depth, h_w, h_w) float32 (row-major reshape, same as PyTorch .view)
    """
    B, K = x.shape
    Kw, Np = wt.shape
    N = img_depth * h_w * h_w
    assert Kw == K and b2.shape == (1, Np) and Np >= N

    # Robustness: pad lane dim if caller passed unpadded params (init pre-pads already).
    if Np % _LANE != 0:
        Np_new = _round_up(Np, _LANE)
        wt = jnp.pad(wt, ((0, 0), (0, Np_new - Np)))
        b2 = jnp.pad(b2, ((0, 0), (0, Np_new - Np)))
        Np = Np_new

    tm = _choose_tm(B, K, Np)
    Bp = _round_up(B, tm)
    x_pad = x if Bp == B else jnp.pad(x, ((0, Bp - B), (0, 0)))

    y = pl.pallas_call(
        _expand_kernel,
        out_shape=jax.ShapeDtypeStruct((Bp, Np), jnp.float32),
        grid=(Bp // tm,),
        in_specs=[
            pl.BlockSpec((tm, K), lambda i: (i, 0)),     # streamed x tile (tiny)
            pl.BlockSpec((K, Np), lambda i: (0, 0)),     # weight: resident, DMA'd once
            pl.BlockSpec((1, Np), lambda i: (0, 0)),     # bias:   resident, DMA'd once
        ],
        out_specs=pl.BlockSpec((tm, Np), lambda i: (i, 0)),
        compiler_params=pltpu.CompilerParams(
            dimension_semantics=("parallel",),
            vmem_limit_bytes=_VMEM_LIMIT,
        ),
    )(x_pad, wt, b2)

    if Bp != B or Np != N:
        y = y[:B, :N]

    # PyTorch: x.view(-1, img_depth, h_w, h_w) -- row-major reshape, plain-JAX glue.
    return y.reshape(-1, img_depth, h_w, h_w)


def init_expanding_params(key, n_classes, img_depth, h_w):
    """nn.Linear-style init; weight stored pre-transposed and padded to a 128-multiple."""
    out_dim = img_depth * h_w * h_w
    out_pad = _round_up(out_dim, _LANE)
    kw, kb = jax.random.split(key)
    bound = 1.0 / math.sqrt(n_classes)
    weight = jax.random.uniform(kw, (out_dim, n_classes), jnp.float32, -bound, bound)
    bias = jax.random.uniform(kb, (out_dim,), jnp.float32, -bound, bound)
    # One-time transpose + zero-pad, off the per-call hot path.
    wt = jnp.zeros((n_classes, out_pad), jnp.float32).at[:, :out_dim].set(weight.T)
    b2 = jnp.zeros((1, out_pad), jnp.float32).at[:, :out_dim].set(bias)
    return wt, b2


if __name__ == "__main__":
    key = jax.random.PRNGKey(0)
    kp, kx, kp2, kx2, kp3, kx3 = jax.random.split(key, 6)

    # ---- small shapes consistent with the module (B=2, n_classes=10, 4x16x16) ----
    n_classes, img_depth, h_w, B = 10, 4, 16, 2
    wt, b2 = init_expanding_params(kp, n_classes, img_depth, h_w)
    x = jax.random.normal(kx, (B, n_classes), jnp.float32)

    out = jax.block_until_ready(expanding_layer(x, wt, b2, img_depth, h_w))
    N = img_depth * h_w * h_w
    ref = (x @ wt + b2)[:, :N].reshape(-1, img_depth, h_w, h_w)
    assert out.shape == (B, img_depth, h_w, h_w)
    assert jnp.allclose(out, ref, atol=1e-5, rtol=1e-5)

    # ---- larger batch / image (tiled, >=2 parallel batch blocks, out_dim=4096) ----
    n_classes2, img_depth2, h_w2, B2 = 10, 4, 32, 256
    wt2, b22 = init_expanding_params(kp2, n_classes2, img_depth2, h_w2)
    x2 = jax.random.normal(kx2, (B2, n_classes2), jnp.float32)

    out2 = jax.block_until_ready(expanding_layer(x2, wt2, b22, img_depth2, h_w2))
    N2 = img_depth2 * h_w2 * h_w2
    ref2 = (x2 @ wt2 + b22)[:, :N2].reshape(-1, img_depth2, h_w2, h_w2)
    assert out2.shape == (B2, img_depth2, h_w2, h_w2)
    assert jnp.allclose(out2, ref2, atol=1e-5, rtol=1e-5)

    # ---- awkward shapes: out_dim not a 128-multiple, batch not a tile-multiple ----
    n_classes3, img_depth3, h_w3, B3 = 10, 3, 10, 130   # out_dim = 300 -> padded to 384
    wt3, b23 = init_expanding_params(kp3, n_classes3, img_depth3, h_w3)
    x3 = jax.random.normal(kx3, (B3, n_classes3), jnp.float32)

    out3 = jax.block_until_ready(expanding_layer(x3, wt3, b23, img_depth3, h_w3))
    N3 = img_depth3 * h_w3 * h_w3
    ref3 = (x3 @ wt3 + b23)[:, :N3].reshape(-1, img_depth3, h_w3, h_w3)
    assert out3.shape == (B3, img_depth3, h_w3, h_w3)
    assert jnp.allclose(out3, ref3, atol=1e-5, rtol=1e-5)

    print("KERNEL_OK")
</pallas_src>

<mosaic_0001>
module attributes {stable_mosaic.version = 11 : i64} {
  func.func @_expand_kernel(%arg0: i32, %arg1: memref<8x10xf32, #tpu.memory_space<vmem>>, %arg2: memref<10x1024xf32, #tpu.memory_space<vmem>>, %arg3: memref<1x1024xf32, #tpu.memory_space<vmem>>, %arg4: memref<8x1024xf32, #tpu.memory_space<vmem>>) attributes {dimension_semantics = [#tpu.dimension_semantics<parallel>], iteration_bounds = array<i64: 1>, scalar_prefetch = 0 : i64, scratch_operands = 0 : i64, tpu.core_type = #tpu.core_type<tc>, window_params = [{transform_indices = @transform_0, window_bounds = array<i64: 8, 10>}, {pipeline_mode = #tpu.pipeline_mode<synchronous>, transform_indices = @transform_1, window_bounds = array<i64: 10, 1024>}, {pipeline_mode = #tpu.pipeline_mode<synchronous>, transform_indices = @transform_2, window_bounds = array<i64: 1, 1024>}, {transform_indices = @transform_3, window_bounds = array<i64: 8, 1024>}]} {
    %c0 = arith.constant 0 : index
    %c0_0 = arith.constant 0 : index
    %0 = vector.load %arg1[%c0, %c0_0] : memref<8x10xf32, #tpu.memory_space<vmem>>, vector<8x10xf32>
    %c0_1 = arith.constant 0 : index
    %c0_2 = arith.constant 0 : index
    %1 = vector.load %arg2[%c0_1, %c0_2] : memref<10x1024xf32, #tpu.memory_space<vmem>>, vector<10x1024xf32>
    %cst = arith.constant dense<0.000000e+00> : vector<8x1024xf32>
    %2 = tpu.matmul %0, %1, %cst {dimension_numbers = #tpu.dot_dimension_numbers<[1], [0], [0], [1], [0, 0, 1, 1], [], []>} : vector<8x10xf32>, vector<10x1024xf32>, vector<8x1024xf32> -> vector<8x1024xf32>
    %c0_3 = arith.constant 0 : index
    %c0_4 = arith.constant 0 : index
    %3 = vector.load %arg3[%c0_3, %c0_4] : memref<1x1024xf32, #tpu.memory_space<vmem>>, vector<1x1024xf32>
    %4 = vector.broadcast %3 : vector<1x1024xf32> to vector<8x1024xf32>
    %5 = arith.addf %2, %4 : vector<8x1024xf32>
    %c0_5 = arith.constant 0 : index
    %c0_6 = arith.constant 0 : index
    %6 = vector.load %arg4[%c0_5, %c0_6] : memref<8x1024xf32, #tpu.memory_space<vmem>>, vector<8x1024xf32>
    tpu.vector_store %arg4[%c0_5, %c0_6], %5 {strides = array<i32>} : memref<8x1024xf32, #tpu.memory_space<vmem>>, vector<8x1024xf32>,
    return
  }
  func.func @transform_0(%arg0: i32) -> (i32, i32) {
    %c0_i32 = arith.constant 0 : i32
    %c0_i32_0 = arith.constant 0 : i32
    return %arg0, %c0_i32 : i32, i32
  }
  func.func @transform_1(%arg0: i32) -> (i32, i32) {
    %c0_i32 = arith.constant 0 : i32
    %c0_i32_0 = arith.constant 0 : i32
    %c0_i32_1 = arith.constant 0 : i32
    return %c0_i32, %c0_i32_0 : i32, i32
  }
  func.func @transform_2(%arg0: i32) -> (i32, i32) {
    %c0_i32 = arith.constant 0 : i32
    %c0_i32_0 = arith.constant 0 : i32
    %c0_i32_1 = arith.constant 0 : i32
    return %c0_i32, %c0_i32_0 : i32, i32
  }
  func.func @transform_3(%arg0: i32) -> (i32, i32) {
    %c0_i32 = arith.constant 0 : i32
    %c0_i32_0 = arith.constant 0 : i32
    return %arg0, %c0_i32 : i32, i32
  }
}

</mosaic_0001>

<bundles_post_ra>
// kernel: expanding_layer.1
= control target key start
LH: loop header
LB: loop body
LE: loop exit
PB: predicated region body
PF: predicated region fallthrough
CT: control target
= control target key end

     0   :  { %8 = vsyncpa [#allocation3], 0  ;;  %s451_s12 = smov [#allocation2]   ;;  %s520_s0 = inlined_call_operand.vmem [shape: f32[8,10], index: 0, kind: input, shape index: {}]   ;;  %s521_s1 = inlined_call_operand.hbm [shape: f32[10,1024], index: 1, kind: input, shape index: {}]   ;;  %s522_s2 = inlined_call_operand.vmem [shape: f32[1,1024], index: 2, kind: input, shape index: {}]   ;;  %s523_s3 = inlined_call_operand.vmem [shape: f32[8,1024], index: 3, kind: output, shape index: {}]  }
   0x1   :  { %s16_s13 = sshll.u32 %s451_s12, 4  ;;  %s17_s13 = int_to_ptr.vmem [resolvable:$true] %s16_s13 }
   0x2   :  { %s437_s14 = scalar_lea.vmem %s17_s13, 2048  ;;  %p442_p1 = scmp.lt.s32.totalorder %s17_s13, %s17_s13 }
   0x3   :  { %p438_p0 = scmp.ne.s32.totalorder %s17_s13, %s437_s14  ;;  %p443_p2 = scmp.lt.s32.totalorder %s437_s14, %s437_s14 }
   0x5   :  { %p444_p3 = por %p443_p2, %p442_p1 }
   0x7   :  { %p445_p4 = pnand %p444_p3, %p438_p0 }
   0x9   :  { %448 = shalt.err (!%p445_p4)
}
   0xa   :  { %s452_s15 = smov 1024   ;;  %s453_s16 = smov 64  }
   0xb   :  { %22 = dma.hbm_to_vmem [thread:$0]  %s521_s1, 2048, %s17_s13, [#allocation3], %s452_s15, %s452_s15, %s453_s16  }
   0xc   :  { %449 = dma.done.wait [#allocation3], 2048  }
   0xd   :  { %450 = vsyncadd [#allocation3], 4294965248  ;;  %v454_v0 = vmov 0.0   ;;  %vm91_vm0 = vcmask 1041408   ;;  %v38_v1 = vld [vmem:[#allocation2 + $0x48] sm:$0x3]  ;;  %v47_v18 = vlaneseq }
   0xe   :  { %180 = vmatprep.mubr.f32.mxu0 %v454_v0  ;;  %251 = vmatprep.mubr.f32.mxu1 %v454_v0  ;;  %v40_v2 = vld [vmem:[#allocation2 + $0x58] sm:$0x3]  ;;  %v37_v3 = vld [vmem:[#allocation2 + $0x40] sm:$0x3]  ;;  %v39_v4 = vld [vmem:[#allocation2 + $0x50] sm:$0x3] }
   0xf   :  { %413 = vmatprep.subr.msk.mxu0 %vm91_vm0, %v38_v1  ;;  %416 = vmatprep.subr.msk.mxu1 %vm91_vm0, %v40_v2  ;;  %v30_v5 = vld [vmem:[#allocation2 + $0x8] sm:$0xff]  ;;  %v32_v6 = vld [vmem:[#allocation2 + $0x18] sm:$0xff]  ;;  %v29_v7 = vld [vmem:[#allocation2] sm:$0xff]  ;;  %vm87_vm1 = vcmask 80896   ;;  %v48_v19 = vshrl.u32 %v47_v18, 7 }
  0x10   :  { %414 = vmatpush1.msk.msra.mxu0 %vm91_vm0, %v37_v3  ;;  %417 = vmatpush1.msk.msra.mxu1 %vm91_vm0, %v39_v4  ;;  %v31_v8 = vld [vmem:[#allocation2 + $0x10] sm:$0xff]  ;;  %v28_v9 = vld [vmem:[%s520_s0] sm:$0xff]  ;;  %v42_v10 = vld [vmem:[#allocation2 + $0x68] sm:$0x3] }
  0x11   :  { %146 = vmatprep.subr.mxu0 %v30_v5  ;;  %217 = vmatprep.subr.mxu1 %v32_v6  ;;  %v44_v11 = vld [vmem:[#allocation2 + $0x78] sm:$0x3]  ;;  %v41_v12 = vld [vmem:[#allocation2 + $0x60] sm:$0x3]  ;;  %v43_v13 = vld [vmem:[#allocation2 + $0x70] sm:$0x3] }
  0x12   :  { %147 = vmatpush1.msra.mxu0 %v29_v7  ;;  %218 = vmatpush1.msra.mxu1 %v31_v8  ;;  %v34_v14 = vld [vmem:[#allocation2 + $0x28] sm:$0xff]  ;;  %v36_v15 = vld [vmem:[#allocation2 + $0x38] sm:$0xff]  ;;  %v33_v16 = vld [vmem:[#allocation2 + $0x20] sm:$0xff]  ;;  %v49_v20 = vsub.s32 0, %v48_v19  ;;  %v57_v21 = vsub.s32 2, %v48_v19  ;;  %v53_v23 = vsub.s32 1, %v48_v19 }
  0x13   :  { %415 = vmatmul.mubr.msk.f32.vlgmr.msra.gmra.mxu0 %vm87_vm1, %v28_v9  ;;  %418 = vmatmul.mubr.msk.f32.vlgmr.msra.gmra.mxu1 %vm87_vm1, %v28_v9  ;;  %v35_v17 = vld [vmem:[#allocation2 + $0x30] sm:$0xff]  ;;  %v45_v22 = vld [vmem:[%s522_s2] sm:$0xff]  ;;  %v61_v24 = vsub.s32 3, %v48_v19  ;;  %v65_v29 = vsub.s32 4, %v48_v19  ;;  %v73_v30 = vsub.s32 6, %v48_v19  ;;  %v69_v35 = vsub.s32 5, %v48_v19 }
  0x14   :  { %419 = vmatprep.subr.msk.mxu0 %vm91_vm0, %v42_v10  ;;  %422 = vmatprep.subr.msk.mxu1 %vm91_vm0, %v44_v11  ;;  %v50_v25 = vrot.slane %v45_v22, %v49_v20  ;;  %v58_v26 = vrot.slane %v45_v22, %v57_v21  ;;  %v54_v27 = vrot.slane %v45_v22, %v53_v23  ;;  %v77_v36 = vsub.s32 7, %v48_v19 }
  0x15   :  { %420 = vmatpush1.msk.msra.mxu0 %vm91_vm0, %v41_v12  ;;  %423 = vmatpush1.msk.msra.mxu1 %vm91_vm0, %v43_v13  ;;  %v62_v28 = vrot.slane %v45_v22, %v61_v24  ;;  %v66_v41 = vrot.slane %v45_v22, %v65_v29  ;;  %v74_v42 = vrot.slane %v45_v22, %v73_v30 }
  0x16   :  { %288 = vmatprep.subr.mxu0 %v34_v14  ;;  %359 = vmatprep.subr.mxu1 %v36_v15  ;;  %v70_v43 = vrot.slane %v45_v22, %v69_v35  ;;  %v78_v44 = vrot.slane %v45_v22, %v77_v36 }
  0x17   :  { %289 = vmatpush1.msra.mxu0 %v33_v16  ;;  %322 = vmatprep.mubr.f32.mxu0 %v454_v0 }
  0x18   :  { %360 = vmatpush1.msra.mxu1 %v35_v17  ;;  %393 = vmatprep.mubr.f32.mxu1 %v454_v0 }
  0x19   :  { %421 = vmatmul.mubr.msk.f32.vlgmr.msra.gmra.mxu0 %vm87_vm1, %v28_v9  ;;  %424 = vmatmul.mubr.msk.f32.vlgmr.msra.gmra.mxu1 %vm87_vm1, %v28_v9 }
  0xd3   :  { %v182_v31 = vpop.f32.mrf.mxu0  ;;  %v253_v32 = vpop.f32.mrf.mxu1 }
  0xd4   :  { %v183_v33 = vadd.f32 %v182_v31, %v50_v25  ;;  %v254_v34 = vadd.f32 %v253_v32, %v58_v26 }
  0xd5   :  { %v184_v37 = vpop.f32.mrf.mxu0  ;;  %v255_v38 = vpop.f32.mrf.mxu1 }
  0xd6   :  { %400 = vst [vmem:[%s523_s3] sm:$0xff] %v183_v33  ;;  %402 = vst [vmem:[%s523_s3 + $0x10] sm:$0xff] %v254_v34  ;;  %v185_v39 = vadd.f32 %v184_v37, %v54_v27  ;;  %v256_v40 = vadd.f32 %v255_v38, %v62_v28 }
  0xd8   :  { %401 = vst [vmem:[%s523_s3 + $0x8] sm:$0xff] %v185_v39  ;;  %403 = vst [vmem:[%s523_s3 + $0x18] sm:$0xff] %v256_v40 }
  0xd9   :  { %v324_v45 = vpop.f32.mrf.mxu0  ;;  %v395_v46 = vpop.f32.mrf.mxu1 }
  0xda   :  { %v325_v47 = vadd.f32 %v324_v45, %v66_v41  ;;  %v396_v48 = vadd.f32 %v395_v46, %v74_v42 }
  0xdb   :  { %v326_v49 = vpop.f32.mrf.mxu0  ;;  %v397_v50 = vpop.f32.mrf.mxu1 }
  0xdc   :  { %404 = vst [vmem:[%s523_s3 + $0x20] sm:$0xff] %v325_v47  ;;  %406 = vst [vmem:[%s523_s3 + $0x30] sm:$0xff] %v396_v48  ;;  %v327_v51 = vadd.f32 %v326_v49, %v70_v43  ;;  %v398_v52 = vadd.f32 %v397_v50, %v78_v44 }
  0xde   :  { %405 = vst [vmem:[%s523_s3 + $0x28] sm:$0xff] %v327_v51  ;;  %407 = vst [vmem:[%s523_s3 + $0x38] sm:$0xff] %v398_v52 }
  0xdf   :  { %412 = vsyncpa [#allocation3], 1 }

</bundles_post_ra>
